<compile_context>
chip_gen: v5e
topology: v5e:2x2
jax: 0.10.0
libtpu: 0.0.40
codegen_flags: <defaults>
</compile_context>

<pallas_src>
import functools

import jax
import jax.numpy as jnp
from jax.experimental import pallas as pl
from jax.experimental.pallas import tpu as pltpu


def _round_up(x: int, m: int) -> int:
    return ((x + m - 1) // m) * m


# ----------------------------------------------------------------------------
# Fused Pallas kernel:
#   enc_f  = relu(frames[f] @ Wenc + benc)                       (per frame f)
#   hidden = relu( sum_f enc_f @ Wpred_enc[f]
#                  + ptp @ Wpred_ptp + latent @ Wpred_lat + bpred )
#   out    = hidden @ Wdec + bdec
# ----------------------------------------------------------------------------
def _fused_ebm_kernel(frames_ref, ptp_ref, latent_ref,
                      enc_w_ref, enc_b_ref,
                      pred_we_ref, pred_wp_ref, pred_wl_ref, pred_b_ref,
                      dec_w_ref, dec_b_ref,
                      out_ref, *, seq_len):
    f32 = jnp.float32
    bf16 = jnp.bfloat16

    # Hidden-layer pre-activation accumulator (tile_m, hidden_dim), f32.
    h = jnp.dot(ptp_ref[...], pred_wp_ref[...], preferred_element_type=f32)
    h = h + jnp.dot(latent_ref[...], pred_wl_ref[...],
                    preferred_element_type=f32)

    # Encoder + its contribution to the predictor, one conditional frame at a
    # time.  Encodings stay on-chip (no 64-lane-wide partial stores, no HBM
    # round-trip, no concat materialization).
    for f in range(seq_len):
        x_f = frames_ref[f]                                 # (tile_m, CHW) bf16
        e_f = jnp.dot(x_f, enc_w_ref[...], preferred_element_type=f32)
        e_f = jnp.maximum(e_f + enc_b_ref[...], 0.0)        # encoder ReLU (f32)
        h = h + jnp.dot(e_f.astype(bf16), pred_we_ref[f],
                        preferred_element_type=f32)

    h = jnp.maximum(h + pred_b_ref[...], 0.0)               # predictor ReLU (f32)

    y = jnp.dot(h.astype(bf16), dec_w_ref[...], preferred_element_type=f32)
    out_ref[...] = (y + dec_b_ref[...]).astype(out_ref.dtype)   # lane-dense store


# ----------------------------------------------------------------------------
# Model: parameters + fused forward
# ----------------------------------------------------------------------------
class LatentMinimizationEBMPallas:
    def __init__(self, *, num_conditional_frames, latent_size,
                 c, h, w, ptp_size, enc_dim, hidden_dim, key, tile_m=512):
        self.latent_size = latent_size
        self.num_conditional_frames = num_conditional_frames
        self.c, self.h, self.w = c, h, w
        self.ptp_size = ptp_size
        self.enc_dim = enc_dim
        self.hidden_dim = hidden_dim
        self.tile_m_target = tile_m

        frame_flat = c * h * w
        self.frame_flat = frame_flat
        pred_in = num_conditional_frames * enc_dim + ptp_size + latent_size

        keys = jax.random.split(key, 6)

        def init_linear(kw, kb, fan_in, fan_out):
            # PyTorch-style uniform(+-1/sqrt(fan_in)) init.
            bound = 1.0 / float(fan_in) ** 0.5
            W = jax.random.uniform(kw, (fan_in, fan_out), jnp.float32,
                                   minval=-bound, maxval=bound)
            B = jax.random.uniform(kb, (fan_out,), jnp.float32,
                                   minval=-bound, maxval=bound)
            return W, B

        enc_w, enc_b = init_linear(keys[0], keys[1], frame_flat, enc_dim)
        pred_w, pred_b = init_linear(keys[2], keys[3], pred_in, hidden_dim)
        dec_w, dec_b = init_linear(keys[4], keys[5], hidden_dim, frame_flat)

        # Matmul weights live in bf16 (MXU inputs); biases stay f32.
        self.enc_w = enc_w.astype(jnp.bfloat16)
        self.enc_b = enc_b.reshape(1, enc_dim)
        # Split predictor weight into its concat row blocks so the kernel never
        # materializes the (bs, seq*enc + ptp + latent) concatenated activation.
        s = num_conditional_frames * enc_dim
        self.pred_we = pred_w[:s].reshape(
            num_conditional_frames, enc_dim, hidden_dim).astype(jnp.bfloat16)
        self.pred_wp = pred_w[s:s + ptp_size].astype(jnp.bfloat16)
        self.pred_wl = pred_w[s + ptp_size:].astype(jnp.bfloat16)
        self.pred_b = pred_b.reshape(1, hidden_dim)
        self.dec_w = dec_w.astype(jnp.bfloat16)
        self.dec_b = dec_b.reshape(1, frame_flat)

    # --- latent sampling -----------------------------------------------------
    def sample_latent(self, bs, key):
        # torch.randn(bs, latent_size)
        # TODO(synk): could be folded into the kernel with pltpu.prng_seed +
        # pltpu.stateful_normal to make the whole forward a single launch.
        return jax.random.normal(key, (bs, self.latent_size), jnp.float32)

    # --- fused forward (single pallas_call) ----------------------------------
    @functools.partial(jax.jit, static_argnums=0)
    def _fused_forward(self, conditional_frames, ptp, latent):
        bs, seq, c, h, w = conditional_frames.shape
        frame_flat = self.frame_flat

        # Pad the batch to a sublane-friendly multiple and tile it.
        m_pad = _round_up(bs, 16)
        tile_m = min(self.tile_m_target, m_pad)
        grid_m = pl.cdiv(m_pad, tile_m)
        m_pad = grid_m * tile_m

        # Layout plumbing (cheap, fused under jit): frames -> (seq, m_pad, CHW)
        # so the kernel indexes frames_ref[f] along the leading axis.
        frames = conditional_frames.reshape(bs, seq, frame_flat)
        frames = jnp.transpose(frames, (1, 0, 2))
        frames = jnp.pad(frames, ((0, 0), (0, m_pad - bs), (0, 0)))
        frames = frames.astype(jnp.bfloat16)
        ptp_p = jnp.pad(ptp, ((0, m_pad - bs), (0, 0))).astype(jnp.bfloat16)
        lat_p = jnp.pad(latent, ((0, m_pad - bs), (0, 0))).astype(jnp.bfloat16)

        kernel = functools.partial(_fused_ebm_kernel, seq_len=seq)
        out = pl.pallas_call(
            kernel,
            out_shape=jax.ShapeDtypeStruct((m_pad, frame_flat), jnp.float32),
            grid=(grid_m,),
            in_specs=[
                # batch-tiled activations
                pl.BlockSpec((seq, tile_m, frame_flat), lambda i: (0, i, 0)),
                pl.BlockSpec((tile_m, self.ptp_size), lambda i: (i, 0)),
                pl.BlockSpec((tile_m, self.latent_size), lambda i: (i, 0)),
                # VMEM-resident weights (constant index_map -> stay put)
                pl.BlockSpec((frame_flat, self.enc_dim), lambda i: (0, 0)),
                pl.BlockSpec((1, self.enc_dim), lambda i: (0, 0)),
                pl.BlockSpec((seq, self.enc_dim, self.hidden_dim),
                             lambda i: (0, 0, 0)),
                pl.BlockSpec((self.ptp_size, self.hidden_dim), lambda i: (0, 0)),
                pl.BlockSpec((self.latent_size, self.hidden_dim),
                             lambda i: (0, 0)),
                pl.BlockSpec((1, self.hidden_dim), lambda i: (0, 0)),
                pl.BlockSpec((self.hidden_dim, frame_flat), lambda i: (0, 0)),
                pl.BlockSpec((1, frame_flat), lambda i: (0, 0)),
            ],
            out_specs=pl.BlockSpec((tile_m, frame_flat), lambda i: (i, 0)),
            compiler_params=pltpu.CompilerParams(
                dimension_semantics=("parallel",)),
        )(frames, ptp_p, lat_p,
          self.enc_w, self.enc_b,
          self.pred_we, self.pred_wp, self.pred_wl, self.pred_b,
          self.dec_w, self.dec_b)

        return out[:bs].reshape(bs, c, h, w)

    def forward(self, conditional_frames, ptp, latent_key):
        latent = self.sample_latent(conditional_frames.shape[0], latent_key)
        return self._fused_forward(conditional_frames, ptp, latent)

    # --- pure-JAX reference (same bf16 weights) for correctness checking -----
    def reference_forward(self, conditional_frames, ptp, latent):
        bs, seq, c, h, w = conditional_frames.shape
        bf16 = jnp.bfloat16
        f32 = jnp.float32
        flat = conditional_frames.reshape(bs * seq, c * h * w).astype(bf16)
        enc = jnp.dot(flat, self.enc_w, preferred_element_type=f32)
        enc = jnp.maximum(enc + self.enc_b, 0.0).reshape(bs, seq, self.enc_dim)
        hid = jnp.dot(ptp.astype(bf16), self.pred_wp, preferred_element_type=f32)
        hid = hid + jnp.dot(latent.astype(bf16), self.pred_wl,
                            preferred_element_type=f32)
        for f in range(seq):
            hid = hid + jnp.dot(enc[:, f].astype(bf16), self.pred_we[f],
                                preferred_element_type=f32)
        hid = jnp.maximum(hid + self.pred_b, 0.0)
        y = jnp.dot(hid.astype(bf16), self.dec_w,
                    preferred_element_type=f32) + self.dec_b
        return y.reshape(bs, c, h, w)

    # TODO(synk): compute_optimal_latent / optimize_latent (SGD / LBFGS inner
    # loops over the latent) are training-time utilities, not part of the
    # forward pass; not implemented here.


# ----------------------------------------------------------------------------
# Demo / smoke test
# ----------------------------------------------------------------------------
if __name__ == "__main__":
    bs = 2
    seq = 2           # num_conditional_frames
    c, h, w = 4, 16, 16
    ptp_size = 8
    latent_size = 16
    enc_dim = 64
    hidden_dim = 128

    root = jax.random.PRNGKey(0)
    k_params, k_frames, k_ptp, k_latent = jax.random.split(root, 4)

    model = LatentMinimizationEBMPallas(
        num_conditional_frames=seq, latent_size=latent_size,
        c=c, h=h, w=w, ptp_size=ptp_size,
        enc_dim=enc_dim, hidden_dim=hidden_dim, key=k_params)

    conditional_frames = jax.random.normal(
        k_frames, (bs, seq, c, h, w), jnp.float32)
    ptp = jax.random.normal(k_ptp, (bs, ptp_size), jnp.float32)

    predicted_frame = model.forward(conditional_frames, ptp, k_latent)
    predicted_frame = jax.block_until_ready(predicted_frame)

    assert predicted_frame.shape == (bs, c, h, w), predicted_frame.shape
    assert predicted_frame.dtype == jnp.float32

    # Numerical sanity check against the pure-JAX reference (same bf16 weights
    # and same latent sample).
    latent = model.sample_latent(bs, k_latent)
    ref = model.reference_forward(conditional_frames, ptp, latent)
    max_err = float(jnp.max(jnp.abs(predicted_frame - ref)))
    assert max_err < 5e-2, f"max abs diff vs reference: {max_err}"

    print("KERNEL_OK")
</pallas_src>

<mosaic_0001>
module attributes {stable_mosaic.version = 11 : i64} {
  func.func @_fused_ebm_kernel(%arg0: i32, %arg1: memref<2x16x1024xbf16, #tpu.memory_space<vmem>>, %arg2: memref<16x8xbf16, #tpu.memory_space<vmem>>, %arg3: memref<16x16xbf16, #tpu.memory_space<vmem>>, %arg4: memref<1024x64xbf16, #tpu.memory_space<vmem>>, %arg5: memref<1x64xf32, #tpu.memory_space<vmem>>, %arg6: memref<2x64x128xbf16, #tpu.memory_space<vmem>>, %arg7: memref<8x128xbf16, #tpu.memory_space<vmem>>, %arg8: memref<16x128xbf16, #tpu.memory_space<vmem>>, %arg9: memref<1x128xf32, #tpu.memory_space<vmem>>, %arg10: memref<128x1024xbf16, #tpu.memory_space<vmem>>, %arg11: memref<1x1024xf32, #tpu.memory_space<vmem>>, %arg12: memref<16x1024xf32, #tpu.memory_space<vmem>>) attributes {dimension_semantics = [#tpu.dimension_semantics<parallel>], iteration_bounds = array<i64: 1>, scalar_prefetch = 0 : i64, scratch_operands = 0 : i64, tpu.core_type = #tpu.core_type<tc>, window_params = [{transform_indices = @transform_0, window_bounds = array<i64: 2, 16, 1024>}, {transform_indices = @transform_1, window_bounds = array<i64: 16, 8>}, {transform_indices = @transform_2, window_bounds = array<i64: 16, 16>}, {pipeline_mode = #tpu.pipeline_mode<synchronous>, transform_indices = @transform_3, window_bounds = array<i64: 1024, 64>}, {pipeline_mode = #tpu.pipeline_mode<synchronous>, transform_indices = @transform_4, window_bounds = array<i64: 1, 64>}, {pipeline_mode = #tpu.pipeline_mode<synchronous>, transform_indices = @transform_5, window_bounds = array<i64: 2, 64, 128>}, {pipeline_mode = #tpu.pipeline_mode<synchronous>, transform_indices = @transform_6, window_bounds = array<i64: 8, 128>}, {pipeline_mode = #tpu.pipeline_mode<synchronous>, transform_indices = @transform_7, window_bounds = array<i64: 16, 128>}, {pipeline_mode = #tpu.pipeline_mode<synchronous>, transform_indices = @transform_8, window_bounds = array<i64: 1, 128>}, {pipeline_mode = #tpu.pipeline_mode<synchronous>, transform_indices = @transform_9, window_bounds = array<i64: 128, 1024>}, {pipeline_mode = #tpu.pipeline_mode<synchronous>, transform_indices = @transform_10, window_bounds = array<i64: 1, 1024>}, {transform_indices = @transform_11, window_bounds = array<i64: 16, 1024>}]} {
    %c0 = arith.constant 0 : index
    %c0_0 = arith.constant 0 : index
    %0 = vector.load %arg2[%c0, %c0_0] : memref<16x8xbf16, #tpu.memory_space<vmem>>, vector<16x8xbf16>
    %c0_1 = arith.constant 0 : index
    %c0_2 = arith.constant 0 : index
    %1 = vector.load %arg7[%c0_1, %c0_2] : memref<8x128xbf16, #tpu.memory_space<vmem>>, vector<8x128xbf16>
    %cst = arith.constant dense<0.000000e+00> : vector<16x128xf32>
    %2 = tpu.matmul %0, %1, %cst {dimension_numbers = #tpu.dot_dimension_numbers<[1], [0], [0], [1], [0, 0, 1, 1], [], []>} : vector<16x8xbf16>, vector<8x128xbf16>, vector<16x128xf32> -> vector<16x128xf32>
    %c0_3 = arith.constant 0 : index
    %c0_4 = arith.constant 0 : index
    %3 = vector.load %arg3[%c0_3, %c0_4] : memref<16x16xbf16, #tpu.memory_space<vmem>>, vector<16x16xbf16>
    %c0_5 = arith.constant 0 : index
    %c0_6 = arith.constant 0 : index
    %4 = vector.load %arg8[%c0_5, %c0_6] : memref<16x128xbf16, #tpu.memory_space<vmem>>, vector<16x128xbf16>
    %cst_7 = arith.constant dense<0.000000e+00> : vector<16x128xf32>
    %5 = tpu.matmul %3, %4, %cst_7 {dimension_numbers = #tpu.dot_dimension_numbers<[1], [0], [0], [1], [0, 0, 1, 1], [], []>} : vector<16x16xbf16>, vector<16x128xbf16>, vector<16x128xf32> -> vector<16x128xf32>
    %6 = arith.addf %2, %5 : vector<16x128xf32>
    %c0_8 = arith.constant 0 : index
    %c0_9 = arith.constant 0 : index
    %c0_10 = arith.constant 0 : index
    %7 = vector.load %arg1[%c0_8, %c0_9, %c0_10] : memref<2x16x1024xbf16, #tpu.memory_space<vmem>>, vector<1x16x1024xbf16>
    %8 = vector.shape_cast %7 : vector<1x16x1024xbf16> to vector<16x1024xbf16>
    %c0_11 = arith.constant 0 : index
    %c0_12 = arith.constant 0 : index
    %9 = vector.load %arg4[%c0_11, %c0_12] : memref<1024x64xbf16, #tpu.memory_space<vmem>>, vector<1024x64xbf16>
    %cst_13 = arith.constant dense<0.000000e+00> : vector<16x64xf32>
    %10 = tpu.matmul %8, %9, %cst_13 {dimension_numbers = #tpu.dot_dimension_numbers<[1], [0], [0], [1], [0, 0, 1, 1], [], []>} : vector<16x1024xbf16>, vector<1024x64xbf16>, vector<16x64xf32> -> vector<16x64xf32>
    %c0_14 = arith.constant 0 : index
    %c0_15 = arith.constant 0 : index
    %11 = vector.load %arg5[%c0_14, %c0_15] : memref<1x64xf32, #tpu.memory_space<vmem>>, vector<1x64xf32>
    %12 = vector.broadcast %11 : vector<1x64xf32> to vector<16x64xf32>
    %13 = arith.addf %10, %12 : vector<16x64xf32>
    %cst_16 = arith.constant 0.000000e+00 : f32
    %14 = vector.broadcast %cst_16 : f32 to vector<16x64xf32>
    %15 = arith.maximumf %13, %14 : vector<16x64xf32>
    %16 = arith.truncf %15 : vector<16x64xf32> to vector<16x64xbf16>
    %c0_17 = arith.constant 0 : index
    %c0_18 = arith.constant 0 : index
    %c0_19 = arith.constant 0 : index
    %17 = vector.load %arg6[%c0_17, %c0_18, %c0_19] : memref<2x64x128xbf16, #tpu.memory_space<vmem>>, vector<1x64x128xbf16>
    %18 = vector.shape_cast %17 : vector<1x64x128xbf16> to vector<64x128xbf16>
    %cst_20 = arith.constant dense<0.000000e+00> : vector<16x128xf32>
    %19 = tpu.matmul %16, %18, %cst_20 {dimension_numbers = #tpu.dot_dimension_numbers<[1], [0], [0], [1], [0, 0, 1, 1], [], []>} : vector<16x64xbf16>, vector<64x128xbf16>, vector<16x128xf32> -> vector<16x128xf32>
    %20 = arith.addf %6, %19 : vector<16x128xf32>
    %c1 = arith.constant 1 : index
    %c0_21 = arith.constant 0 : index
    %c0_22 = arith.constant 0 : index
    %21 = vector.load %arg1[%c1, %c0_21, %c0_22] : memref<2x16x1024xbf16, #tpu.memory_space<vmem>>, vector<1x16x1024xbf16>
    %22 = vector.shape_cast %21 : vector<1x16x1024xbf16> to vector<16x1024xbf16>
    %c0_23 = arith.constant 0 : index
    %c0_24 = arith.constant 0 : index
    %23 = vector.load %arg4[%c0_23, %c0_24] : memref<1024x64xbf16, #tpu.memory_space<vmem>>, vector<1024x64xbf16>
    %cst_25 = arith.constant dense<0.000000e+00> : vector<16x64xf32>
    %24 = tpu.matmul %22, %23, %cst_25 {dimension_numbers = #tpu.dot_dimension_numbers<[1], [0], [0], [1], [0, 0, 1, 1], [], []>} : vector<16x1024xbf16>, vector<1024x64xbf16>, vector<16x64xf32> -> vector<16x64xf32>
    %c0_26 = arith.constant 0 : index
    %c0_27 = arith.constant 0 : index
    %25 = vector.load %arg5[%c0_26, %c0_27] : memref<1x64xf32, #tpu.memory_space<vmem>>, vector<1x64xf32>
    %26 = vector.broadcast %25 : vector<1x64xf32> to vector<16x64xf32>
    %27 = arith.addf %24, %26 : vector<16x64xf32>
    %cst_28 = arith.constant 0.000000e+00 : f32
    %28 = vector.broadcast %cst_28 : f32 to vector<16x64xf32>
    %29 = arith.maximumf %27, %28 : vector<16x64xf32>
    %30 = arith.truncf %29 : vector<16x64xf32> to vector<16x64xbf16>
    %c1_29 = arith.constant 1 : index
    %c0_30 = arith.constant 0 : index
    %c0_31 = arith.constant 0 : index
    %31 = vector.load %arg6[%c1_29, %c0_30, %c0_31] : memref<2x64x128xbf16, #tpu.memory_space<vmem>>, vector<1x64x128xbf16>
    %32 = vector.shape_cast %31 : vector<1x64x128xbf16> to vector<64x128xbf16>
    %cst_32 = arith.constant dense<0.000000e+00> : vector<16x128xf32>
    %33 = tpu.matmul %30, %32, %cst_32 {dimension_numbers = #tpu.dot_dimension_numbers<[1], [0], [0], [1], [0, 0, 1, 1], [], []>} : vector<16x64xbf16>, vector<64x128xbf16>, vector<16x128xf32> -> vector<16x128xf32>
    %34 = arith.addf %20, %33 : vector<16x128xf32>
    %c0_33 = arith.constant 0 : index
    %c0_34 = arith.constant 0 : index
    %35 = vector.load %arg9[%c0_33, %c0_34] : memref<1x128xf32, #tpu.memory_space<vmem>>, vector<1x128xf32>
    %36 = vector.broadcast %35 : vector<1x128xf32> to vector<16x128xf32>
    %37 = arith.addf %34, %36 : vector<16x128xf32>
    %cst_35 = arith.constant 0.000000e+00 : f32
    %38 = vector.broadcast %cst_35 : f32 to vector<16x128xf32>
    %39 = arith.maximumf %37, %38 : vector<16x128xf32>
    %40 = arith.truncf %39 : vector<16x128xf32> to vector<16x128xbf16>
    %c0_36 = arith.constant 0 : index
    %c0_37 = arith.constant 0 : index
    %41 = vector.load %arg10[%c0_36, %c0_37] : memref<128x1024xbf16, #tpu.memory_space<vmem>>, vector<128x1024xbf16>
    %cst_38 = arith.constant dense<0.000000e+00> : vector<16x1024xf32>
    %42 = tpu.matmul %40, %41, %cst_38 {dimension_numbers = #tpu.dot_dimension_numbers<[1], [0], [0], [1], [0, 0, 1, 1], [], []>} : vector<16x128xbf16>, vector<128x1024xbf16>, vector<16x1024xf32> -> vector<16x1024xf32>
    %c0_39 = arith.constant 0 : index
    %c0_40 = arith.constant 0 : index
    %43 = vector.load %arg11[%c0_39, %c0_40] : memref<1x1024xf32, #tpu.memory_space<vmem>>, vector<1x1024xf32>
    %44 = vector.broadcast %43 : vector<1x1024xf32> to vector<16x1024xf32>
    %45 = arith.addf %42, %44 : vector<16x1024xf32>
    %c0_41 = arith.constant 0 : index
    %c0_42 = arith.constant 0 : index
    %46 = vector.load %arg12[%c0_41, %c0_42] : memref<16x1024xf32, #tpu.memory_space<vmem>>, vector<16x1024xf32>
    tpu.vector_store %arg12[%c0_41, %c0_42], %45 {strides = array<i32>} : memref<16x1024xf32, #tpu.memory_space<vmem>>, vector<16x1024xf32>,
    return
  }
  func.func @transform_0(%arg0: i32) -> (i32, i32, i32) {
    %c0_i32 = arith.constant 0 : i32
    %c0_i32_0 = arith.constant 0 : i32
    %c0_i32_1 = arith.constant 0 : i32
    return %c0_i32, %arg0, %c0_i32_0 : i32, i32, i32
  }
  func.func @transform_1(%arg0: i32) -> (i32, i32) {
    %c0_i32 = arith.constant 0 : i32
    %c0_i32_0 = arith.constant 0 : i32
    return %arg0, %c0_i32 : i32, i32
  }
  func.func @transform_2(%arg0: i32) -> (i32, i32) {
    %c0_i32 = arith.constant 0 : i32
    %c0_i32_0 = arith.constant 0 : i32
    return %arg0, %c0_i32 : i32, i32
  }
  func.func @transform_3(%arg0: i32) -> (i32, i32) {
    %c0_i32 = arith.constant 0 : i32
    %c0_i32_0 = arith.constant 0 : i32
    %c0_i32_1 = arith.constant 0 : i32
    return %c0_i32, %c0_i32_0 : i32, i32
  }
  func.func @transform_4(%arg0: i32) -> (i32, i32) {
    %c0_i32 = arith.constant 0 : i32
    %c0_i32_0 = arith.constant 0 : i32
    %c0_i32_1 = arith.constant 0 : i32
    return %c0_i32, %c0_i32_0 : i32, i32
  }
  func.func @transform_5(%arg0: i32) -> (i32, i32, i32) {
    %c0_i32 = arith.constant 0 : i32
    %c0_i32_0 = arith.constant 0 : i32
    %c0_i32_1 = arith.constant 0 : i32
    %c0_i32_2 = arith.constant 0 : i32
    return %c0_i32, %c0_i32_0, %c0_i32_1 : i32, i32, i32
  }
  func.func @transform_6(%arg0: i32) -> (i32, i32) {
    %c0_i32 = arith.constant 0 : i32
    %c0_i32_0 = arith.constant 0 : i32
    %c0_i32_1 = arith.constant 0 : i32
    return %c0_i32, %c0_i32_0 : i32, i32
  }
  func.func @transform_7(%arg0: i32) -> (i32, i32) {
    %c0_i32 = arith.constant 0 : i32
    %c0_i32_0 = arith.constant 0 : i32
    %c0_i32_1 = arith.constant 0 : i32
    return %c0_i32, %c0_i32_0 : i32, i32
  }
  func.func @transform_8(%arg0: i32) -> (i32, i32) {
    %c0_i32 = arith.constant 0 : i32
    %c0_i32_0 = arith.constant 0 : i32
    %c0_i32_1 = arith.constant 0 : i32
    return %c0_i32, %c0_i32_0 : i32, i32
  }
  func.func @transform_9(%arg0: i32) -> (i32, i32) {
    %c0_i32 = arith.constant 0 : i32
    %c0_i32_0 = arith.constant 0 : i32
    %c0_i32_1 = arith.constant 0 : i32
    return %c0_i32, %c0_i32_0 : i32, i32
  }
  func.func @transform_10(%arg0: i32) -> (i32, i32) {
    %c0_i32 = arith.constant 0 : i32
    %c0_i32_0 = arith.constant 0 : i32
    %c0_i32_1 = arith.constant 0 : i32
    return %c0_i32, %c0_i32_0 : i32, i32
  }
  func.func @transform_11(%arg0: i32) -> (i32, i32) {
    %c0_i32 = arith.constant 0 : i32
    %c0_i32_0 = arith.constant 0 : i32
    return %arg0, %c0_i32 : i32, i32
  }
}

</mosaic_0001>

<bundles_post_ra>
// kernel: _fused_forward.1
= control target key start
LH: loop header
LB: loop body
LE: loop exit
PB: predicated region body
PF: predicated region fallthrough
CT: control target
= control target key end

     0   :  { %16 = vsyncpa [#allocation3], 0  ;;  %s2435_s20 = smov [#allocation2]   ;;  %s2436_s22 = smov 64   ;;  %s3356_s0 = inlined_call_operand.vmem [shape: bf16[2,16,1024], index: 0, kind: input, shape index: {}]   ;;  %s3357_s1 = inlined_call_operand.vmem [shape: bf16[16,8], index: 1, kind: input, shape index: {}]   ;;  %s3358_s2 = inlined_call_operand.vmem [shape: bf16[16,16], index: 2, kind: input, shape index: {}]   ;;  %s3359_s3 = inlined_call_operand.hbm [shape: bf16[1024,64], index: 3, kind: input, shape index: {}]   ;;  %s3360_s4 = inlined_call_operand.vmem [shape: f32[1,64], index: 4, kind: input, shape index: {}]   ;;  %s3361_s5 = inlined_call_operand.vmem [shape: bf16[2,64,128], index: 5, kind: input, shape index: {}]   ;;  %s3362_s6 = inlined_call_operand.vmem [shape: bf16[8,128], index: 6, kind: input, shape index: {}]   ;;  %s3363_s7 = inlined_call_operand.vmem [shape: bf16[16,128], index: 7, kind: input, shape index: {}]   ;;  %s3364_s8 = inlined_call_operand.vmem [shape: f32[1,128], index: 8, kind: input, shape index: {}]   ;;  %s3365_s9 = inlined_call_operand.vmem [shape: bf16[128,1024], index: 9, kind: input, shape index: {}]   ;;  %s3366_s10 = inlined_call_operand.vmem [shape: f32[1,1024], index: 10, kind: input, shape index: {}]   ;;  %s3367_s11 = inlined_call_operand.vmem [shape: f32[16,1024], index: 11, kind: output, shape index: {}]  }
   0x1   :  { %s27_s19 = sshll.u32 %s3359_s3, 4  ;;  %s29_s21 = sshll.u32 %s2435_s20, 4  ;;  %s28_s19 = int_to_ptr.hbm [resolvable:$true] %s27_s19  ;;  %s30_s21 = int_to_ptr.vmem [resolvable:$true] %s29_s21 }
   0x2   :  { %s2437_s23 = smov 4  }
   0x3   :  { %35 = dma.hbm_to_vmem [thread:$0]  %s28_s19, 8192, %s30_s21, [#allocation3], %s2436_s22, %s2436_s22, %s2437_s23  }
   0x4   :  { %2433 = dma.done.wait [#allocation3], 8192  }
   0x5   :  { %2434 = vsyncadd [#allocation3], 4294959104  ;;  %vm100_vm0 = vcmask 1043456   ;;  %v2501_v0 = vld [vmem:[#allocation2 + $0x38] sm:$0xff]  ;;  %v2251_v2 = vld [vmem:[%s3363_s7] sm:$0xff]  ;;  %vm73_vm1 = vcmask 130048  }
   0x6   :  { %v2503_v1 = vld [vmem:[#allocation2 + $0x78] sm:$0xff]  ;;  %v57_v4 = vld [vmem:[%s3362_s6] sm:$0xf]  ;;  %682 = vmatpush.bf16.msra.mxu2 %v2501_v0  ;;  %v2515_v6 = vld [vmem:[#allocation2 + $0x30] sm:$0xff]  ;;  %84 = vmatpush.bf16.msra.mxu0 %v2251_v2  ;;  %vm96_vm2 = vcmask 64512   ;;  %vm829_vm3 = vcmask 523264  }
   0x7   :  { %v2508_v3 = vld [vmem:[#allocation2 + $0xb8] sm:$0xff]  ;;  %696 = vmatpush.bf16.msra.mxu3 %v2503_v1  ;;  %v102_v5 = vsel %vm100_vm0, %v57_v4, 0  ;;  %v2517_v7 = vld [vmem:[#allocation2 + $0x70] sm:$0xff]  ;;  %v2529_v11 = vld [vmem:[#allocation2 + $0x28] sm:$0xff] }
   0x8   :  { %v2519_v8 = vld [vmem:[#allocation2 + $0xf8] sm:$0xff]  ;;  %111 = vmatpush.bf16.msra.mxu1 %v102_v5  ;;  %v2523_v9 = vld [vmem:[#allocation2 + $0xb0] sm:$0xff]  ;;  %v2531_v12 = vld [vmem:[#allocation2 + $0x68] sm:$0xff] }
   0x9   :  { %v2525_v10 = vld [vmem:[#allocation2 + $0xf0] sm:$0xff]  ;;  %v2535_v13 = vld [vmem:[#allocation2 + $0xa8] sm:$0xff]  ;;  %v2541_v15 = vld [vmem:[#allocation2 + $0x20] sm:$0xff] }
   0xa   :  { %710 = vmatpush.bf16.msrb.mxu0 %v2508_v3  ;;  %683 = vmatpush.bf16.msra.mxu2 %v2515_v6  ;;  %v2537_v14 = vld [vmem:[#allocation2 + $0xe8] sm:$0xff]  ;;  %v2543_v16 = vld [vmem:[#allocation2 + $0x60] sm:$0xff]  ;;  %v2559_v21 = vld [vmem:[#allocation2 + $0x18] sm:$0xff] }
   0xb   :  { %697 = vmatpush.bf16.msra.mxu3 %v2517_v7  ;;  %v2250_v17 = vld [vmem:[%s3358_s2] sm:$0xff]  ;;  %v2561_v22 = vld [vmem:[#allocation2 + $0x58] sm:$0xff]  ;;  %v2571_v25 = vld [vmem:[#allocation2 + $0x10] sm:$0xff] }
   0xc   :  { %724 = vmatpush.bf16.msrb.mxu1 %v2519_v8  ;;  %v2249_v18 = vld [vmem:[%s3357_s1] sm:$0xff]  ;;  %1617 = vmatmul.msk.bf16.vlgmr.msra.gmra.mxu0 %vm73_vm1, %v2250_v17  ;;  %v2565_v23 = vld [vmem:[#allocation2 + $0x98] sm:$0xff]  ;;  %v2573_v26 = vld [vmem:[#allocation2 + $0x50] sm:$0xff] }
   0xd   :  { %v2553_v19 = vld [vmem:[#allocation2 + $0xa0] sm:$0xff]  ;;  %1622 = vmatmul.msk.bf16.vlgmr.msra.gmra.mxu1 %vm96_vm2, %v2249_v18  ;;  %v2567_v24 = vld [vmem:[#allocation2 + $0xd8] sm:$0xff]  ;;  %v2577_v27 = vld [vmem:[#allocation2 + $0x90] sm:$0xff] }
   0xe   :  { %711 = vmatpush.bf16.msrb.mxu0 %v2523_v9  ;;  %684 = vmatpush.bf16.msra.mxu2 %v2529_v11  ;;  %v2555_v20 = vld [vmem:[#allocation2 + $0xe0] sm:$0xff]  ;;  %3381 = vst [vmem:[#allocation6_spill] sm:$0xff] %v2567_v24  ;;  %v2579_v28 = vld [vmem:[#allocation2 + $0xd0] sm:$0xff]  ;;  %v2583_v29 = vld [vmem:[#allocation2 + $0x8] sm:$0xff] }
   0xf   :  { %698 = vmatpush.bf16.msra.mxu3 %v2531_v12  ;;  %3380 = vst [vmem:[#allocation5_spill] sm:$0xff] %v2555_v20  ;;  %v2585_v30 = vld [vmem:[#allocation2 + $0x48] sm:$0xff]  ;;  %v2593_v33 = vld [vmem:[#allocation2] sm:$0xff]  ;;  %v2597_v35 = vld [vmem:[#allocation2 + $0x138] sm:$0xff] }
  0x10   :  { %725 = vmatpush.bf16.msrb.mxu1 %v2525_v10  ;;  %3382 = vst [vmem:[#allocation7_spill] sm:$0xff] %v2579_v28  ;;  %v2589_v31 = vld [vmem:[#allocation2 + $0x88] sm:$0xff]  ;;  %v2595_v34 = vld [vmem:[#allocation2 + $0x40] sm:$0xff]  ;;  %v2601_v36 = vld [vmem:[#allocation2 + $0x178] sm:$0xff] }
  0x11   :  { %v2591_v32 = vld [vmem:[#allocation2 + $0xc8] sm:$0xff]  ;;  %v2603_v37 = vld [vmem:[#allocation2 + $0x80] sm:$0xff]  ;;  %v2608_v39 = vld [vmem:[#allocation2 + $0x1b8] sm:$0xff] }
  0x12   :  { %712 = vmatpush.bf16.msrb.mxu0 %v2535_v13  ;;  %685 = vmatpush.bf16.msra.mxu2 %v2541_v15  ;;  %3383 = vst [vmem:[#allocation8_spill] sm:$0xff] %v2591_v32  ;;  %v1625_v38 = vld [vmem:[%s3356_s0] sm:$0xf]  ;;  %v2252_v41 = vld [vmem:[%s3356_s0 + $0x4] sm:$0xf]  ;;  %v2623_v44 = vld [vmem:[#allocation2 + $0x1f8] sm:$0xff] }
  0x13   :  { %699 = vmatpush.bf16.msra.mxu3 %v2543_v16  ;;  %v2256_v40 = vld [vmem:[%s3356_s0 + $0x1c] sm:$0xf0]  ;;  %v1627_v42 = vld [vmem:[%s3356_s0 + $0x20] sm:$0xf0]  ;;  %3385 = vst [vmem:[#allocation10_spill] sm:$0xff] %v2623_v44  ;;  %v2641_v51 = vld [vmem:[#allocation2 + $0x130] sm:$0xff] }
  0x14   :  { %726 = vmatpush.bf16.msrb.mxu1 %v2537_v14  ;;  %v2621_v43 = vld [vmem:[#allocation2 + $0xc0] sm:$0xff]  ;;  %v1633_v45 = vld [vmem:[%s3356_s0 + $0x8] sm:$0xf]  ;;  %v2253_v47 = vld [vmem:[%s3356_s0 + $0xc] sm:$0xf]  ;;  %v1626_v49 = vor.u32 %v2256_v40, %v1625_v38  ;;  %v1630_v50 = vor.u32 %v2252_v41, %v1627_v42 }
  0x15   :  { %3384 = vst [vmem:[#allocation9_spill] sm:$0xff] %v2621_v43  ;;  %v2257_v46 = vld [vmem:[%s3356_s0 + $0x24] sm:$0xf0]  ;;  %v1635_v48 = vld [vmem:[%s3356_s0 + $0x28] sm:$0xf0]  ;;  %v2643_v52 = vld [vmem:[#allocation2 + $0x170] sm:$0xff] }
  0x16   :  { %713 = vmatpush.bf16.msrb.mxu0 %v2553_v19  ;;  %686 = vmatpush.bf16.msra.mxu2 %v2559_v21  ;;  %v1634_v53 = vor.u32 %v2257_v46, %v1633_v45  ;;  %v1638_v54 = vor.u32 %v2253_v47, %v1635_v48  ;;  %v2649_v55 = vld [vmem:[#allocation2 + $0x1b0] sm:$0xff]  ;;  %v2655_v57 = vld [vmem:[#allocation2 + $0x128] sm:$0xff]  ;;  %v2667_v61 = vld [vmem:[#allocation2 + $0x120] sm:$0xff] }
  0x17   :  { %700 = vmatpush.bf16.msra.mxu3 %v2561_v22  ;;  %v2651_v56 = vld [vmem:[#allocation2 + $0x1f0] sm:$0xff]  ;;  %v2657_v58 = vld [vmem:[#allocation2 + $0x168] sm:$0xff]  ;;  %v2669_v62 = vld [vmem:[#allocation2 + $0x160] sm:$0xff] }
  0x18   :  { %727 = vmatpush.bf16.msrb.mxu1 %v2555_v20  ;;  %3386 = vst [vmem:[#allocation11_spill] sm:$0xff] %v2651_v56  ;;  %v2661_v59 = vld [vmem:[#allocation2 + $0x1a8] sm:$0xff]  ;;  %v2673_v63 = vld [vmem:[#allocation2 + $0x1a0] sm:$0xff]  ;;  %v2679_v4 = vld [vmem:[#allocation2 + $0x118] sm:$0xff] }
  0x19   :  { %v2663_v60 = vld [vmem:[#allocation2 + $0x1e8] sm:$0xff]  ;;  %v2675_v2 = vld [vmem:[#allocation2 + $0x1e0] sm:$0xff]  ;;  %v2681_v5 = vld [vmem:[#allocation2 + $0x158] sm:$0xff] }
  0x1a   :  { %714 = vmatpush.bf16.msrb.mxu0 %v2565_v23  ;;  %687 = vmatpush.bf16.msra.mxu2 %v2571_v25  ;;  %3387 = vst [vmem:[#allocation12_spill] sm:$0xff] %v2663_v60  ;;  %v2685_v17 = vld [vmem:[#allocation2 + $0x198] sm:$0xff]  ;;  %v2691_v38 = vld [vmem:[#allocation2 + $0x110] sm:$0xff]  ;;  %v2703_v45 = vld [vmem:[#allocation2 + $0x108] sm:$0xff] }
  0x1b   :  { %701 = vmatpush.bf16.msra.mxu3 %v2573_v26  ;;  %3388 = vst [vmem:[#allocation13_spill] sm:$0xff] %v2675_v2  ;;  %v2687_v18 = vld [vmem:[#allocation2 + $0x1d8] sm:$0xff]  ;;  %v2693_v40 = vld [vmem:[#allocation2 + $0x150] sm:$0xff]  ;;  %v2705_v46 = vld [vmem:[#allocation2 + $0x148] sm:$0xff] }
  0x1c   :  { %728 = vmatpush.bf16.msrb.mxu1 %v2567_v24  ;;  %3389 = vst [vmem:[#allocation14_spill] sm:$0xff] %v2687_v18  ;;  %v2697_v41 = vld [vmem:[#allocation2 + $0x190] sm:$0xff]  ;;  %v2709_v47 = vld [vmem:[#allocation2 + $0x188] sm:$0xff] }
  0x1d   :  { %v2699_v42 = vld [vmem:[#allocation2 + $0x1d0] sm:$0xff]  ;;  %v2711_v48 = vld [vmem:[#allocation2 + $0x1c8] sm:$0xff] }
  0x1e   :  { %715 = vmatpush.bf16.msrb.mxu0 %v2577_v27  ;;  %688 = vmatpush.bf16.msra.mxu2 %v2583_v29  ;;  %3390 = vst [vmem:[#allocation15_spill] sm:$0xff] %v2699_v42 }
  0x1f   :  { %702 = vmatpush.bf16.msra.mxu3 %v2585_v30  ;;  %3391 = vst [vmem:[#allocation16_spill] sm:$0xff] %v2711_v48 }
  0x20   :  { %729 = vmatpush.bf16.msrb.mxu1 %v2579_v28 }
  0x22   :  { %716 = vmatpush.bf16.msrb.mxu0 %v2589_v31  ;;  %689 = vmatpush.bf16.msra.mxu2 %v2593_v33 }
  0x23   :  { %703 = vmatpush.bf16.msra.mxu3 %v2595_v34 }
  0x24   :  { %730 = vmatpush.bf16.msrb.mxu1 %v2591_v32  ;;  %v1651_v32 = vld [vmem:[%s3356_s0 + $0x38] sm:$0xf0] }
  0x25   :  { %690 = vmatmul.bf16.vlgmr.msra.gmra.mxu2 %v1626_v49  ;;  %v2713_v49 = vld [vmem:[#allocation2 + $0x100] sm:$0xff] }
  0x26   :  { %738 = vmatpush.bf16.msrb.mxu2 %v2597_v35  ;;  %717 = vmatpush.bf16.msrb.mxu0 %v2603_v37 }
  0x27   :  { %752 = vmatpush.bf16.msrb.mxu3 %v2601_v36 }
  0x28   :  { %731 = vmatpush.bf16.msrb.mxu1 %v2621_v43  ;;  %704 = vmatmul.bf16.vlgmr.msra.gmra.mxu3 %v1630_v50  ;;  %v2715_v50 = vld [vmem:[#allocation2 + $0x140] sm:$0xff]  ;;  %v2255_v43 = vld [vmem:[%s3356_s0 + $0x1c] sm:$0xf] }
  0x29   :  { %718 = vmatmul.bf16.vlgmr.msrb.gmra.mxu0 %v1634_v53  ;;  %v1641_v53 = vld [vmem:[%s3356_s0 + $0x10] sm:$0xf] }
  0x2a   :  { %766 = vmatpush.bf16.msra.mxu0 %v2608_v39  ;;  %739 = vmatpush.bf16.msrb.mxu2 %v2641_v51 }
  0x2b   :  { %753 = vmatpush.bf16.msrb.mxu3 %v2643_v52  ;;  %732 = vmatmul.bf16.vlgmr.msrb.gmra.mxu1 %v1638_v54  ;;  %v2258_v54 = vld [vmem:[%s3356_s0 + $0x2c] sm:$0xf0] }
  0x2c   :  { %780 = vmatpush.bf16.msra.mxu1 %v2623_v44  ;;  %v2259_v44 = vld [vmem:[%s3356_s0 + $0x34] sm:$0xf0]  ;;  %v1642_v28 = vor.u32 %v2258_v54, %v1641_v53 }
  0x2d   :  { %v1962_v54 = vld [vmem:[%s3356_s0 + $0x58] sm:$0xf] }
  0x2e   :  { %767 = vmatpush.bf16.msra.mxu0 %v2649_v55  ;;  %740 = vmatpush.bf16.msrb.mxu2 %v2655_v57 }
  0x2f   :  { %754 = vmatpush.bf16.msrb.mxu3 %v2657_v58 }
  0x30   :  { %781 = vmatpush.bf16.msra.mxu1 %v2651_v56  ;;  %v1649_v56 = vld [vmem:[%s3356_s0 + $0x18] sm:$0xf] }
  0x31   :  { %v1650_v20 = vor.u32 %v2259_v44, %v1649_v56  ;;  %v2333_v44 = vld [vmem:[%s3356_s0 + $0x64] sm:$0xf0] }
  0x32   :  { %768 = vmatpush.bf16.msra.mxu0 %v2661_v59  ;;  %741 = vmatpush.bf16.msrb.mxu2 %v2667_v61 }
  0x33   :  { %755 = vmatpush.bf16.msrb.mxu3 %v2669_v62 }
  0x34   :  { %782 = vmatpush.bf16.msra.mxu1 %v2663_v60  ;;  %v2733_v60 = vld [vmem:[#allocation2 + $0x1c0] sm:$0xff] }
  0x36   :  { %769 = vmatpush.bf16.msra.mxu0 %v2673_v63  ;;  %742 = vmatpush.bf16.msrb.mxu2 %v2679_v4 }
  0x37   :  { %756 = vmatpush.bf16.msrb.mxu3 %v2681_v5 }
  0x38   :  { %783 = vmatpush.bf16.msra.mxu1 %v2675_v2  ;;  %v2731_v2 = vld [vmem:[#allocation2 + $0x180] sm:$0xff] }
  0x3a   :  { %770 = vmatpush.bf16.msra.mxu0 %v2685_v17  ;;  %743 = vmatpush.bf16.msrb.mxu2 %v2691_v38 }
  0x3b   :  { %757 = vmatpush.bf16.msrb.mxu3 %v2693_v40 }
  0x3c   :  { %784 = vmatpush.bf16.msra.mxu1 %v2687_v18  ;;  %v1643_v18 = vld [vmem:[%s3356_s0 + $0x30] sm:$0xf0] }
  0x3e   :  { %771 = vmatpush.bf16.msra.mxu0 %v2697_v41  ;;  %744 = vmatpush.bf16.msrb.mxu2 %v2703_v45 }
  0x3f   :  { %758 = vmatpush.bf16.msrb.mxu3 %v2705_v46 }
  0x40   :  { %785 = vmatpush.bf16.msra.mxu1 %v2699_v42  ;;  %v2254_v42 = vld [vmem:[%s3356_s0 + $0x14] sm:$0xf] }
  0x41   :  { %v1646_v24 = vor.u32 %v2254_v42, %v1643_v18 }
  0x42   :  { %772 = vmatpush.bf16.msra.mxu0 %v2709_v47  ;;  %745 = vmatpush.bf16.msrb.mxu2 %v2713_v49 }
  0x43   :  { %759 = vmatpush.bf16.msrb.mxu3 %v2715_v50 }
  0x44   :  { %786 = vmatpush.bf16.msra.mxu1 %v2711_v48  ;;  %v1654_v48 = vor.u32 %v2255_v43, %v1651_v32  ;;  %v1946_v43 = vld [vmem:[%s3356_s0 + $0x48] sm:$0xf] }
  0x45   :  { %746 = vmatmul.bf16.vlgmr.msrb.gmra.mxu2 %v1642_v28 }
  0x46   :  { %773 = vmatpush.bf16.msra.mxu0 %v2731_v2  ;;  %760 = vmatmul.bf16.vlgmr.msrb.gmra.mxu3 %v1646_v24  ;;  %v2826_v24 = vld [vmem:[%s3360_s4] ss:$0 sm:$0xff] }
  0x47   :  { %898 = vmatpush.bf16.msra.mxu3 %v2501_v0 }
  0x48   :  { %787 = vmatpush.bf16.msra.mxu1 %v2733_v60 }
  0x49   :  { %774 = vmatmul.bf16.vlgmr.msra.gmra.mxu0 %v1650_v20  ;;  %v3394_v20 = vld [vmem:[#allocation7_spill] sm:$0xff] }
  0x4a   :  { %912 = vmatpush.bf16.msrb.mxu0 %v2503_v1 }
  0x4b   :  { %788 = vmatmul.bf16.vlgmr.msra.gmra.mxu1 %v1654_v48  ;;  %899 = vmatpush.bf16.msra.mxu3 %v2515_v6 }
  0x4c   :  { %926 = vmatpush.bf16.msrb.mxu1 %v2508_v3  ;;  %v2327_v3 = vld [vmem:[%s3361_s5 + $0x18] sm:$0xff] }
  0x4d   :  { %837 = vmatpush.bf16.msra.mxu2 %v2327_v3 }
  0x4e   :  { %913 = vmatpush.bf16.msrb.mxu0 %v2517_v7  ;;  %v2326_v7 = vld [vmem:[%s3361_s5 + $0x10] sm:$0xff] }
  0x4f   :  { %900 = vmatpush.bf16.msra.mxu3 %v2529_v11 }
  0x50   :  { %927 = vmatpush.bf16.msrb.mxu1 %v2523_v9 }
  0x51   :  { %838 = vmatpush.bf16.msra.mxu2 %v2326_v7 }
  0x52   :  { %914 = vmatpush.bf16.msrb.mxu0 %v2531_v12  ;;  %v2325_v12 = vld [vmem:[%s3361_s5 + $0x8] sm:$0xff] }
  0x53   :  { %901 = vmatpush.bf16.msra.mxu3 %v2541_v15  ;;  %v2324_v15 = vld [vmem:[%s3361_s5] sm:$0xff] }
  0x54   :  { %928 = vmatpush.bf16.msrb.mxu1 %v2535_v13 }
  0x55   :  { %839 = vmatpush.bf16.msra.mxu2 %v2325_v12  ;;  %v3397_v12 = vld [vmem:[#allocation10_spill] sm:$0xff] }
  0x56   :  { %915 = vmatpush.bf16.msrb.mxu0 %v2543_v16  ;;  %v3392_v16 = vld [vmem:[#allocation5_spill] sm:$0xff] }
  0x57   :  { %902 = vmatpush.bf16.msra.mxu3 %v2559_v21 }
  0x58   :  { %929 = vmatpush.bf16.msrb.mxu1 %v2553_v19  ;;  %v3393_v19 = vld [vmem:[#allocation6_spill] sm:$0xff] }
  0x59   :  { %840 = vmatpush.bf16.msra.mxu2 %v2324_v15  ;;  %v3398_v15 = vld [vmem:[#allocation11_spill] sm:$0xff] }
  0x5a   :  { %916 = vmatpush.bf16.msrb.mxu0 %v2561_v22 }
  0x5b   :  { %903 = vmatpush.bf16.msra.mxu3 %v2571_v25 }
  0x5c   :  { %930 = vmatpush.bf16.msrb.mxu1 %v2565_v23 }
  0x5d   :  { %940 = vmatpush.bf16.msrb.mxu2 %v2519_v8  ;;  %v3395_v8 = vld [vmem:[#allocation8_spill] sm:$0xff] }
  0x5e   :  { %917 = vmatpush.bf16.msrb.mxu0 %v2573_v26  ;;  %v1938_v26 = vld [vmem:[%s3356_s0 + $0x40] sm:$0xf] }
  0x5f   :  { %904 = vmatpush.bf16.msra.mxu3 %v2583_v29 }
  0x60   :  { %931 = vmatpush.bf16.msrb.mxu1 %v2577_v27  ;;  %v2332_v27 = vld [vmem:[%s3356_s0 + $0x5c] sm:$0xf0] }
  0x61   :  { %941 = vmatpush.bf16.msrb.mxu2 %v2525_v10  ;;  %v1939_v28 = vor.u32 %v2332_v27, %v1938_v26 }
  0x62   :  { %918 = vmatpush.bf16.msrb.mxu0 %v2585_v30 }
  0x63   :  { %905 = vmatpush.bf16.msra.mxu3 %v2593_v33 }
  0x64   :  { %932 = vmatpush.bf16.msrb.mxu1 %v2589_v31 }
  0x65   :  { %942 = vmatpush.bf16.msrb.mxu2 %v2537_v14  ;;  %v3396_v14 = vld [vmem:[#allocation9_spill] sm:$0xff] }
  0x66   :  { %919 = vmatpush.bf16.msrb.mxu0 %v2595_v34  ;;  %906 = vmatmul.bf16.vlgmr.msra.gmra.mxu3 %v1939_v28  ;;  %v2339_v28 = vld [vmem:[%s3361_s5 + $0x38] sm:$0xff] }
  0x67   :  { %954 = vmatpush.bf16.msrb.mxu3 %v2597_v35 }
  0x68   :  { %933 = vmatpush.bf16.msrb.mxu1 %v2603_v37  ;;  %v1940_v37 = vld [vmem:[%s3356_s0 + $0x60] sm:$0xf0] }
  0x69   :  { %943 = vmatpush.bf16.msrb.mxu2 %v3392_v16  ;;  %v3399_v16 = vld [vmem:[#allocation12_spill] sm:$0xff] }
  0x6a   :  { %968 = vmatpush.bf16.msra.mxu0 %v2601_v36  ;;  %v2328_v36 = vld [vmem:[%s3356_s0 + $0x44] sm:$0xf] }
  0x6b   :  { %955 = vmatpush.bf16.msrb.mxu3 %v2641_v51 }
  0x6c   :  { %982 = vmatpush.bf16.msra.mxu1 %v2608_v39  ;;  %v1943_v39 = vor.u32 %v2328_v36, %v1940_v37 }
  0x6d   :  { %944 = vmatpush.bf16.msrb.mxu2 %v3393_v19  ;;  %v2329_v19 = vld [vmem:[%s3356_s0 + $0x4c] sm:$0xf] }
  0x6e   :  { %969 = vmatpush.bf16.msra.mxu0 %v2643_v52 }
  0x6f   :  { %956 = vmatpush.bf16.msrb.mxu3 %v2655_v57  ;;  %920 = vmatmul.bf16.vlgmr.msrb.gmra.mxu0 %v1943_v39 }
  0x70   :  { %983 = vmatpush.bf16.msra.mxu1 %v2649_v55  ;;  %v1947_v55 = vor.u32 %v2333_v44, %v1946_v43  ;;  %v2219_v44 = vld [vmem:[%s3365_s9 + $0x1c0] sm:$0xf] }
  0x71   :  { %945 = vmatpush.bf16.msrb.mxu2 %v3394_v20  ;;  %v1948_v20 = vld [vmem:[%s3356_s0 + $0x68] sm:$0xf0] }
  0x72   :  { %970 = vmatpush.bf16.msra.mxu0 %v2657_v58  ;;  %934 = vmatmul.bf16.vlgmr.msrb.gmra.mxu1 %v1947_v55 }
  0x73   :  { %957 = vmatpush.bf16.msrb.mxu3 %v2667_v61 }
  0x74   :  { %984 = vmatpush.bf16.msra.mxu1 %v2661_v59 }
  0x75   :  { %946 = vmatpush.bf16.msrb.mxu2 %v3395_v8  ;;  %v3403_v8 = vld [vmem:[#allocation16_spill] sm:$0xff] }
  0x76   :  { %971 = vmatpush.bf16.msra.mxu0 %v2669_v62 }
  0x77   :  { %958 = vmatpush.bf16.msrb.mxu3 %v2679_v4 }
  0x78   :  { %985 = vmatpush.bf16.msra.mxu1 %v2673_v63  ;;  %v1954_v63 = vld [vmem:[%s3356_s0 + $0x50] sm:$0xf] }
  0x79   :  { %947 = vmatpush.bf16.msrb.mxu2 %v3396_v14  ;;  %v1964_v14 = vld [vmem:[%s3356_s0 + $0x78] sm:$0xf0] }
  0x7a   :  { %972 = vmatpush.bf16.msra.mxu0 %v2681_v5 }
  0x7b   :  { %959 = vmatpush.bf16.msrb.mxu3 %v2691_v38 }
  0x7c   :  { %986 = vmatpush.bf16.msra.mxu1 %v2685_v17 }
  0x7e   :  { %973 = vmatpush.bf16.msra.mxu0 %v2693_v40 }
  0x7f   :  { %960 = vmatpush.bf16.msrb.mxu3 %v2703_v45 }
  0x80   :  { %987 = vmatpush.bf16.msra.mxu1 %v2697_v41 }
  0x82   :  { %974 = vmatpush.bf16.msra.mxu0 %v2705_v46  ;;  %v2330_v46 = vld [vmem:[%s3356_s0 + $0x54] sm:$0xf] }
  0x83   :  { %961 = vmatpush.bf16.msrb.mxu3 %v2713_v49 }
  0x84   :  { %988 = vmatpush.bf16.msra.mxu1 %v2709_v47  ;;  %v1956_v47 = vld [vmem:[%s3356_s0 + $0x70] sm:$0xf0] }
  0x86   :  { %975 = vmatpush.bf16.msra.mxu0 %v2715_v50  ;;  %v1959_v50 = vor.u32 %v2330_v46, %v1956_v47  ;;  %v2393_v46 = vld [vmem:[%s3365_s9 + $0x1a4] sm:$0xf0]  ;;  %v2389_v47 = vld [vmem:[%s3365_s9 + $0x18c] sm:$0xf] }
  0x87   :  { %1053 = vmatpush.bf16.msra.mxu3 %v2339_v28  ;;  %v2377_v28 = vld [vmem:[%s3365_s9 + $0x124] sm:$0xf0] }
  0x88   :  { %989 = vmatpush.bf16.msra.mxu1 %v2731_v2  ;;  %v2334_v2 = vld [vmem:[%s3356_s0 + $0x6c] sm:$0xf0] }
  0x89   :  { %v86_v0 = vpop.f32.mrf.mxu0  ;;  %v1955_v5 = vor.u32 %v2334_v2, %v1954_v63  ;;  %976 = vmatmul.bf16.vlgmr.msra.gmra.mxu0 %v1959_v50  ;;  %v2197_v50 = vld [vmem:[%s3365_s9 + $0x1a8] sm:$0xf0] }
  0x8a   :  { %v113_v1 = vpop.f32.mrf.mxu1 }
  0x8b   :  { %v2804_v6 = vadd.f32 %v113_v1, %v86_v0  ;;  %962 = vmatmul.bf16.vlgmr.msrb.gmra.mxu3 %v1955_v5  ;;  %v2335_v0 = vld [vmem:[%s3356_s0 + $0x74] sm:$0xf0]  ;;  %v2187_v5 = vld [vmem:[%s3365_s9 + $0x180] sm:$0xf] }
  0x8c   :  { %v1963_v3 = vor.u32 %v2335_v0, %v1962_v54  ;;  %v2384_v54 = vld [vmem:[%s3365_s9 + $0x15c] sm:$0xf0] }
  0x8e   :  { %990 = vmatmul.bf16.vlgmr.msra.gmra.mxu1 %v1963_v3  ;;  %v2200_v3 = vor.u32 %v2389_v47, %v2197_v50 }
  0x91   :  { %v88_v9 = vpop.f32.mrf.mxu0 }
  0x92   :  { %v115_v11 = vpop.f32.mrf.mxu1 }
  0x93   :  { %v2812_v13 = vadd.f32 %v115_v11, %v88_v9 }
  0xa6   :  { %v719_v21 = vpop.f32.mrf.mxu0 }
  0xa8   :  { %v691_v22 = vpop.f32.mrf.mxu2  ;;  %v733_v25 = vpop.f32.mrf.mxu1 }
  0xa9   :  { %v692_v10 = vadd.f32 %v2826_v24, %v691_v22  ;;  %v3400_v22 = vld [vmem:[#allocation13_spill] sm:$0xff] }
  0xab   :  { %v705_v23 = vpop.f32.mrf.mxu3 }
  0xac   :  { %v706_v29 = vadd.f32 %v705_v23, %v692_v10  ;;  %v3401_v23 = vld [vmem:[#allocation14_spill] sm:$0xff]  ;;  %v2331_v10 = vld [vmem:[%s3356_s0 + $0x5c] sm:$0xf] }
  0xad   :  { %v1967_v26 = vor.u32 %v2331_v10, %v1964_v14 }
  0xae   :  { %v721_v30 = vpop.f32.mrf.mxu0  ;;  %v720_v34 = vadd.f32 %v719_v21, %v706_v29  ;;  %v1951_v21 = vor.u32 %v2329_v19, %v1948_v20  ;;  %v2165_v19 = vld [vmem:[%s3365_s9 + $0x168] sm:$0xf0] }
  0xb0   :  { %v693_v31 = vpop.f32.mrf.mxu2  ;;  %v735_v33 = vpop.f32.mrf.mxu1  ;;  %v734_v51 = vadd.f32 %v733_v25, %v720_v34  ;;  %v3402_v25 = vld [vmem:[#allocation15_spill] sm:$0xff] }
  0xb1   :  { %v694_v35 = vadd.f32 %v2826_v24, %v693_v31 }
  0xb3   :  { %v707_v32 = vpop.f32.mrf.mxu3 }
  0xb4   :  { %v708_v52 = vadd.f32 %v707_v32, %v694_v35  ;;  %v2338_v32 = vld [vmem:[%s3361_s5 + $0x30] sm:$0xff] }
  0xb5   :  { %1054 = vmatpush.bf16.msra.mxu3 %v2338_v32  ;;  %v2373_v32 = vld [vmem:[%s3365_s9 + $0x10c] sm:$0xf] }
  0xb6   :  { %v722_v61 = vadd.f32 %v721_v30, %v708_v52 }
  0xb8   :  { %v736_v17 = vadd.f32 %v735_v33, %v722_v61 }
  0xc6   :  { %v775_v59 = vpop.f32.mrf.mxu0 }
  0xc8   :  { %v747_v56 = vpop.f32.mrf.mxu2  ;;  %v789_v62 = vpop.f32.mrf.mxu1 }
  0xc9   :  { %v761_v57 = vpop.f32.mrf.mxu3  ;;  %v748_v58 = vadd.f32 %v747_v56, %v734_v51  ;;  %v2400_v51 = vld [vmem:[%s3365_s9 + $0x1dc] sm:$0xf0] }
  0xca   :  { %v2220_v56 = vor.u32 %v2400_v51, %v2219_v44  ;;  %v2364_v44 = vld [vmem:[%s3365_s9 + $0xc4] sm:$0xf] }
  0xcb   :  { %v762_v4 = vadd.f32 %v761_v57, %v748_v58  ;;  %v2221_v57 = vld [vmem:[%s3365_s9 + $0x1e0] sm:$0xf0]  ;;  %v2227_v58 = vld [vmem:[%s3365_s9 + $0x1c8] sm:$0xf] }
  0xcc   :  { %1476 = vmatpush.bf16.msrb.mxu0 %v2220_v56 }
  0xcd   :  { %v776_v38 = vadd.f32 %v775_v59, %v762_v4  ;;  %v2401_v59 = vld [vmem:[%s3365_s9 + $0x1e4] sm:$0xf0]  ;;  %v2229_v4 = vld [vmem:[%s3365_s9 + $0x1e8] sm:$0xf0] }
  0xce   :  { %v777_v45 = vpop.f32.mrf.mxu0  ;;  %v2228_v2 = vor.u32 %v2401_v59, %v2227_v58  ;;  %v2101_v58 = vld [vmem:[%s3365_s9 + $0xe8] sm:$0xf0] }
  0xcf   :  { %v790_v48 = vadd.f32 %v789_v62, %v776_v38  ;;  %v2388_v38 = vld [vmem:[%s3365_s9 + $0x184] sm:$0xf] }
  0xd0   :  { %v749_v18 = vpop.f32.mrf.mxu2  ;;  %v791_v53 = vpop.f32.mrf.mxu1 }
  0xd1   :  { %v750_v40 = vadd.f32 %v749_v18, %v736_v17  ;;  %v763_v41 = vpop.f32.mrf.mxu3  ;;  %v794_v7 = vmax.f32 %v790_v48, 0.0  ;;  %v2392_v18 = vld [vmem:[%s3365_s9 + $0x19c] sm:$0xf0] }
  0xd3   :  { %v764_v42 = vadd.f32 %v763_v41, %v750_v40  ;;  %v2189_v40 = vld [vmem:[%s3365_s9 + $0x1a0] sm:$0xf0]  ;;  %v2188_v41 = vor.u32 %v2392_v18, %v2187_v5 }
  0xd4   :  { %v2356_v5 = vld [vmem:[%s3365_s9 + $0x84] sm:$0xf] }
  0xd5   :  { %v778_v49 = vadd.f32 %v777_v45, %v764_v42  ;;  %v2192_v42 = vor.u32 %v2388_v38, %v2189_v40  ;;  %v2195_v45 = vld [vmem:[%s3365_s9 + $0x188] sm:$0xf]  ;;  %1477 = vmatpush.bf16.msrb.mxu0 %v2188_v41  ;;  %v2061_v38 = vld [vmem:[%s3365_s9 + $0xa0] sm:$0xf0] }
  0xd6   :  { %v2067_v40 = vld [vmem:[%s3365_s9 + $0x88] sm:$0xf]  ;;  %v2064_v50 = vor.u32 %v2356_v5, %v2061_v38  ;;  %v2205_v5 = vld [vmem:[%s3365_s9 + $0x1b0] sm:$0xf0]  ;;  %v2211_v38 = vld [vmem:[%s3365_s9 + $0x198] sm:$0xf] }
  0xd7   :  { %v792_v1 = vadd.f32 %v791_v53, %v778_v49  ;;  %v2196_v49 = vor.u32 %v2393_v46, %v2195_v45  ;;  %v2155_v53 = vld [vmem:[%s3365_s9 + $0x140] sm:$0xf]  ;;  %v2361_v41 = vld [vmem:[%s3365_s9 + $0xa4] sm:$0xf0]  ;;  %v2357_v45 = vld [vmem:[%s3365_s9 + $0x8c] sm:$0xf] }
  0xd8   :  { %v2069_v46 = vld [vmem:[%s3365_s9 + $0xa8] sm:$0xf0] }
  0xd9   :  { %v795_v9 = vmax.f32 %v792_v1, 0.0 }
  0xdb   :  { %v796_v11 = vpack.c.bf16 %v795_v9, %v794_v7  ;;  %v2380_v7 = vld [vmem:[%s3365_s9 + $0x144] sm:$0xf] }
  0xdc   :  { %v2157_v9 = vld [vmem:[%s3365_s9 + $0x160] sm:$0xf0] }
  0xdd   :  { %1927 = vmatmul.msk.bf16.vlgmr.msra.gmra.mxu2 %vm829_vm3, %v796_v11  ;;  %v2163_v11 = vld [vmem:[%s3365_s9 + $0x148] sm:$0xf]  ;;  %v2160_v20 = vor.u32 %v2380_v7, %v2157_v9  ;;  %v2029_v7 = vld [vmem:[%s3365_s9 + $0x60] sm:$0xf0] }
  0xde   :  { %996 = vmatpush.bf16.msra.mxu2 %v3397_v12  ;;  %v2156_v12 = vor.u32 %v2384_v54, %v2155_v53  ;;  %v2068_v53 = vor.u32 %v2361_v41, %v2067_v40  ;;  %v2027_v54 = vld [vmem:[%s3365_s9 + $0x40] sm:$0xf]  ;;  %v2035_v9 = vld [vmem:[%s3365_s9 + $0x48] sm:$0xf]  ;;  %v2395_v40 = vld [vmem:[%s3365_s9 + $0x1b4] sm:$0xf0] }
  0xdf   :  { %v2391_v41 = vld [vmem:[%s3365_s9 + $0x19c] sm:$0xf] }
  0xe0   :  { %1478 = vmatpush.bf16.msrb.mxu0 %v2156_v12 }
  0xe2   :  { %997 = vmatpush.bf16.msra.mxu2 %v3398_v15  ;;  %v2385_v15 = vld [vmem:[%s3365_s9 + $0x164] sm:$0xf0] }
  0xe6   :  { %998 = vmatpush.bf16.msra.mxu2 %v3399_v16  ;;  %v2381_v16 = vld [vmem:[%s3365_s9 + $0x14c] sm:$0xf] }
  0xe7   :  { %v2168_v14 = vor.u32 %v2381_v16, %v2165_v19  ;;  %v2037_v16 = vld [vmem:[%s3365_s9 + $0x68] sm:$0xf0] }
  0xe9   :  { %v907_v27 = vpop.f32.mrf.mxu3 }
  0xea   :  { %999 = vmatpush.bf16.msra.mxu2 %v3400_v22  ;;  %v908_v39 = vadd.f32 %v2826_v24, %v907_v27  ;;  %v2123_v22 = vld [vmem:[%s3365_s9 + $0x100] sm:$0xf]  ;;  %v2131_v27 = vld [vmem:[%s3365_s9 + $0x108] sm:$0xf] }
  0xec   :  { %v921_v31 = vpop.f32.mrf.mxu0 }
  0xed   :  { %948 = vmatmul.bf16.vlgmr.msrb.gmra.mxu2 %v1951_v21  ;;  %v922_v61 = vadd.f32 %v921_v31, %v908_v39  ;;  %v2164_v21 = vor.u32 %v2385_v15, %v2163_v11  ;;  %v2091_v39 = vld [vmem:[%s3365_s9 + $0xc0] sm:$0xf]  ;;  %v2353_v11 = vld [vmem:[%s3365_s9 + $0x64] sm:$0xf0]  ;;  %v2349_v15 = vld [vmem:[%s3365_s9 + $0x4c] sm:$0xf] }
  0xee   :  { %1000 = vmatpush.bf16.msra.mxu2 %v3401_v23  ;;  %v2376_v23 = vld [vmem:[%s3365_s9 + $0x11c] sm:$0xf0] }
  0xef   :  { %v935_v33 = vpop.f32.mrf.mxu1 }
  0xf0   :  { %v936_v0 = vadd.f32 %v935_v33, %v922_v61 }
  0xf1   :  { %v909_v34 = vpop.f32.mrf.mxu3 }
  0xf2   :  { %1001 = vmatpush.bf16.msra.mxu2 %v3402_v25  ;;  %v910_v52 = vadd.f32 %v2826_v24, %v909_v34  ;;  %v2397_v24 = vld [vmem:[%s3365_s9 + $0x1cc] sm:$0xf]  ;;  %v2372_v25 = vld [vmem:[%s3365_s9 + $0x104] sm:$0xf]  ;;  %v2124_v34 = vor.u32 %v2376_v23, %v2123_v22  ;;  %v2036_v23 = vor.u32 %v2353_v11, %v2035_v9  ;;  %v2181_v9 = vld [vmem:[%s3365_s9 + $0x178] sm:$0xf0] }
  0xf3   :  { %v2232_v17 = vor.u32 %v2397_v24, %v2229_v4  ;;  %v2360_v4 = vld [vmem:[%s3365_s9 + $0x9c] sm:$0xf0] }
  0xf4   :  { %v923_v37 = vpop.f32.mrf.mxu0  ;;  %1479 = vmatpush.bf16.msrb.mxu0 %v2124_v34  ;;  %v2345_v34 = vld [vmem:[%s3365_s9 + $0x24] sm:$0xf0] }
  0xf5   :  { %v924_v48 = vadd.f32 %v923_v37, %v910_v52  ;;  %v2132_v37 = vor.u32 %v2377_v28, %v2131_v27  ;;  %v2099_v52 = vld [vmem:[%s3365_s9 + $0xc8] sm:$0xf]  ;;  %v1995_v28 = vld [vmem:[%s3365_s9] sm:$0xf] }
  0xf6   :  { %1002 = vmatpush.bf16.msra.mxu2 %v3403_v8 }
  0xf7   :  { %v937_v43 = vpop.f32.mrf.mxu1 }
  0xf8   :  { %v938_v8 = vadd.f32 %v937_v43, %v924_v48  ;;  %v2368_v43 = vld [vmem:[%s3365_s9 + $0xdc] sm:$0xf0] }
  0xf9   :  { %v2092_v61 = vor.u32 %v2368_v43, %v2091_v39  ;;  %v2005_v39 = vld [vmem:[%s3365_s9 + $0x28] sm:$0xf0]  ;;  %v2235_v43 = vld [vmem:[%s3365_s9 + $0x1d0] sm:$0xf] }
  0xfa   :  { %1003 = vmatpush.bf16.msra.mxu2 %v2733_v60  ;;  %v2337_v60 = vld [vmem:[%s3361_s5 + $0x28] sm:$0xff] }
  0xfb   :  { %1055 = vmatpush.bf16.msra.mxu3 %v2337_v60  ;;  %v2133_v60 = vld [vmem:[%s3365_s9 + $0x128] sm:$0xf0]  ;;  %1480 = vmatpush.bf16.msrb.mxu0 %v2092_v61  ;;  %v2399_v61 = vld [vmem:[%s3365_s9 + $0x1dc] sm:$0xf] }
  0xfc   :  { %v2136_v51 = vor.u32 %v2373_v32, %v2133_v60  ;;  %v1997_v60 = vld [vmem:[%s3365_s9 + $0x20] sm:$0xf0] }
  0xfd   :  { %1004 = vmatmul.bf16.vlgmr.msra.gmra.mxu2 %v1967_v26  ;;  %v2125_v26 = vld [vmem:[%s3365_s9 + $0x120] sm:$0xf0] }
  0xfe   :  { %1504 = vmatpush.bf16.msrb.mxu2 %v2228_v2 }
 0x102   :  { %1505 = vmatpush.bf16.msrb.mxu2 %v2196_v49 }
 0x106   :  { %v2965_v1 = vpop.f32.mrf.mxu0  ;;  %1506 = vmatpush.bf16.msrb.mxu2 %v2164_v21 }
 0x10a   :  { %1507 = vmatpush.bf16.msrb.mxu2 %v2132_v37  ;;  %v2341_v37 = vld [vmem:[%s3365_s9 + $0xc] sm:$0xf] }
 0x10b   :  { %v991_v31 = vpop.f32.mrf.mxu1 }
 0x10e   :  { %v2927_v62 = vpop.f32.mrf.mxu3 }
 0x113   :  { %v993_v49 = vpop.f32.mrf.mxu1 }
 0x160   :  { %v842_v29 = vpop.f32.mrf.mxu2 }
 0x161   :  { %v2893_v30 = vadd.f32 %v842_v29, %v2804_v6  ;;  %v2336_v6 = vld [vmem:[%s3361_s5 + $0x20] sm:$0xff] }
 0x162   :  { %1056 = vmatpush.bf16.msra.mxu3 %v2336_v6  ;;  %v2128_v6 = vor.u32 %v2372_v25, %v2125_v26 }
 0x166   :  { %1518 = vmatpush.bf16.msrb.mxu3 %v2232_v17 }
 0x168   :  { %v844_v35 = vpop.f32.mrf.mxu2 }
 0x169   :  { %v2902_v36 = vadd.f32 %v844_v35, %v2812_v13  ;;  %v2396_v13 = vld [vmem:[%s3365_s9 + $0x1c4] sm:$0xf]  ;;  %v965_v35 = vpop.f32.mrf.mxu3 }
 0x16a   :  { %v2224_v63 = vor.u32 %v2396_v13, %v2221_v57  ;;  %1519 = vmatpush.bf16.msrb.mxu3 %v2200_v3  ;;  %v2093_v13 = vld [vmem:[%s3365_s9 + $0xe0] sm:$0xf0]  ;;  %v2365_v57 = vld [vmem:[%s3365_s9 + $0xcc] sm:$0xf]  ;;  %v2072_v3 = vor.u32 %v2357_v45, %v2069_v46  ;;  %v2213_v45 = vld [vmem:[%s3365_s9 + $0x1b8] sm:$0xf0] }
 0x16b   :  { %v2096_v2 = vor.u32 %v2364_v44, %v2093_v13  ;;  %v2104_v18 = vor.u32 %v2365_v57, %v2101_v58  ;;  %v2008_v44 = vor.u32 %v2341_v37, %v2005_v39  ;;  %v2398_v13 = vld [vmem:[%s3365_s9 + $0x1d4] sm:$0xf]  ;;  %v2403_v57 = vld [vmem:[%s3365_s9 + $0x1f4] sm:$0xf0]  ;;  %v2216_v46 = vor.u32 %v2391_v41, %v2213_v45  ;;  %v2075_v37 = vld [vmem:[%s3365_s9 + $0x90] sm:$0xf] }
 0x16c   :  { %1490 = vmatpush.bf16.msrb.mxu1 %v2224_v63  ;;  %v979_v63 = vpop.f32.mrf.mxu0  ;;  %v2346_v45 = vld [vmem:[%s3365_s9 + $0x2c] sm:$0xf0] }
 0x16e   :  { %1520 = vmatpush.bf16.msrb.mxu3 %v2168_v14 }
 0x170   :  { %v949_v55 = vpop.f32.mrf.mxu2  ;;  %1491 = vmatpush.bf16.msrb.mxu1 %v2192_v42 }
 0x171   :  { %v950_v29 = vadd.f32 %v949_v55, %v936_v0  ;;  %v2369_v55 = vld [vmem:[%s3365_s9 + $0xe4] sm:$0xf0]  ;;  %v2352_v0 = vld [vmem:[%s3365_s9 + $0x5c] sm:$0xf0] }
 0x172   :  { %v2100_v24 = vor.u32 %v2369_v55, %v2099_v52  ;;  %1521 = vmatpush.bf16.msrb.mxu3 %v2136_v51  ;;  %v2402_v51 = vld [vmem:[%s3365_s9 + $0x1ec] sm:$0xf0]  ;;  %v2237_v55 = vld [vmem:[%s3365_s9 + $0x1f0] sm:$0xf0] }
 0x173   :  { %v964_v56 = vadd.f32 %v2927_v62, %v950_v29  ;;  %v2059_v62 = vld [vmem:[%s3365_s9 + $0x80] sm:$0xf]  ;;  %v2236_v52 = vor.u32 %v2402_v51, %v2235_v43  ;;  %v2240_v58 = vor.u32 %v2398_v13, %v2237_v55  ;;  %v2362_v43 = vld [vmem:[%s3365_s9 + $0xac] sm:$0xf0]  ;;  %v2077_v51 = vld [vmem:[%s3365_s9 + $0xb0] sm:$0xf0] }
 0x174   :  { %1492 = vmatpush.bf16.msrb.mxu1 %v2160_v20  ;;  %v2060_v48 = vor.u32 %v2360_v4, %v2059_v62  ;;  %1508 = vmatpush.bf16.msrb.mxu2 %v2100_v24  ;;  %v2028_v20 = vor.u32 %v2352_v0, %v2027_v54  ;;  %v2344_v29 = vld [vmem:[%s3365_s9 + $0x1c] sm:$0xf0]  ;;  %v2394_v62 = vld [vmem:[%s3365_s9 + $0x1ac] sm:$0xf0]  ;;  %v2390_v4 = vld [vmem:[%s3365_s9 + $0x194] sm:$0xf]  ;;  %v2076_v13 = vor.u32 %v2362_v43, %v2075_v37 }
 0x175   :  { %v978_v42 = vadd.f32 %v2965_v1, %v964_v56  ;;  %v2348_v1 = vld [vmem:[%s3365_s9 + $0x44] sm:$0xf]  ;;  %v1996_v32 = vor.u32 %v2344_v29, %v1995_v28  ;;  %v2243_v56 = vld [vmem:[%s3365_s9 + $0x1d8] sm:$0xf]  ;;  %v2366_v28 = vld [vmem:[%s3365_s9 + $0xd4] sm:$0xf] }
 0x176   :  { %1522 = vmatpush.bf16.msrb.mxu3 %v2104_v18  ;;  %1481 = vmatpush.bf16.msrb.mxu0 %v2060_v48  ;;  %v2032_v22 = vor.u32 %v2348_v1, %v2029_v7  ;;  %v2208_v18 = vor.u32 %v2390_v4, %v2205_v5  ;;  %v2386_v48 = vld [vmem:[%s3365_s9 + $0x16c] sm:$0xf0]  ;;  %v2179_v54 = vld [vmem:[%s3365_s9 + $0x158] sm:$0xf]  ;;  %v2383_v7 = vld [vmem:[%s3365_s9 + $0x15c] sm:$0xf] }
 0x177   :  { %v992_v12 = vadd.f32 %v991_v31, %v978_v42  ;;  %v2340_v31 = vld [vmem:[%s3365_s9 + $0x4] sm:$0xf]  ;;  %v2212_v42 = vor.u32 %v2395_v40, %v2211_v38  ;;  %v2387_v0 = vld [vmem:[%s3365_s9 + $0x174] sm:$0xf0]  ;;  %v2184_v11 = vor.u32 %v2383_v7, %v2181_v9 }
 0x178   :  { %v951_v10 = vpop.f32.mrf.mxu2  ;;  %1493 = vmatpush.bf16.msrb.mxu1 %v2128_v6  ;;  %1509 = vmatpush.bf16.msrb.mxu2 %v2068_v53  ;;  %v2173_v53 = vld [vmem:[%s3365_s9 + $0x170] sm:$0xf0]  ;;  %v2363_v55 = vld [vmem:[%s3365_s9 + $0xb4] sm:$0xf0] }
 0x179   :  { %v952_v33 = vadd.f32 %v951_v10, %v938_v8  ;;  %v2040_v8 = vor.u32 %v2349_v15, %v2037_v16  ;;  %v2378_v15 = vld [vmem:[%s3365_s9 + $0x12c] sm:$0xf0]  ;;  %v2374_v16 = vld [vmem:[%s3365_s9 + $0x114] sm:$0xf]  ;;  %v2051_v4 = vld [vmem:[%s3365_s9 + $0x58] sm:$0xf] }
 0x17a   :  { %1523 = vmatpush.bf16.msrb.mxu3 %v2072_v3  ;;  %1482 = vmatpush.bf16.msrb.mxu0 %v2028_v20  ;;  %v2180_v3 = vor.u32 %v2387_v0, %v2179_v54  ;;  %v2141_v20 = vld [vmem:[%s3365_s9 + $0x130] sm:$0xf0]  ;;  %v2355_v5 = vld [vmem:[%s3365_s9 + $0x74] sm:$0xf0]  ;;  %v2021_v54 = vld [vmem:[%s3365_s9 + $0x38] sm:$0xf0] }
 0x17b   :  { %v966_v59 = vadd.f32 %v965_v35, %v952_v33  ;;  %v2003_v33 = vld [vmem:[%s3365_s9 + $0x8] sm:$0xf]  ;;  %v2000_v35 = vor.u32 %v2340_v31, %v1997_v60  ;;  %v2109_v31 = vld [vmem:[%s3365_s9 + $0xf0] sm:$0xf0]  ;;  %v2371_v60 = vld [vmem:[%s3365_s9 + $0xf4] sm:$0xf0]  ;;  %v2052_v41 = vor.u32 %v2355_v5, %v2051_v4 }
 0x17c   :  { %1494 = vmatpush.bf16.msrb.mxu1 %v2096_v2  ;;  %1510 = vmatpush.bf16.msrb.mxu2 %v2036_v23  ;;  %v2004_v6 = vor.u32 %v2345_v34, %v2003_v33  ;;  %v2203_v2 = vld [vmem:[%s3365_s9 + $0x190] sm:$0xf]  ;;  %v2144_v23 = vor.u32 %v2374_v16, %v2141_v20  ;;  %v2112_v33 = vor.u32 %v2366_v28, %v2109_v31 }
 0x17d   :  { %v980_v47 = vadd.f32 %v979_v63, %v966_v59  ;;  %v2244_v59 = vor.u32 %v2403_v57, %v2243_v56  ;;  %v2245_v63 = vld [vmem:[%s3365_s9 + $0x1f8] sm:$0xf0] }
 0x17e   :  { %1524 = vmatpush.bf16.msrb.mxu3 %v2040_v8  ;;  %1483 = vmatpush.bf16.msrb.mxu0 %v1996_v32  ;;  %v2248_v24 = vor.u32 %v2399_v61, %v2245_v63  ;;  %v2375_v8 = vld [vmem:[%s3365_s9 + $0x11c] sm:$0xf]  ;;  %v2115_v32 = vld [vmem:[%s3365_s9 + $0xd8] sm:$0xf]  ;;  %v2043_v61 = vld [vmem:[%s3365_s9 + $0x50] sm:$0xf] }
 0x17f   :  { %v994_v19 = vadd.f32 %v993_v49, %v980_v47  ;;  %v2171_v47 = vld [vmem:[%s3365_s9 + $0x150] sm:$0xf]  ;;  %v2382_v49 = vld [vmem:[%s3365_s9 + $0x154] sm:$0xf]  ;;  %v2116_v34 = vor.u32 %v2371_v60, %v2115_v32  ;;  %v2359_v56 = vld [vmem:[%s3365_s9 + $0x9c] sm:$0xf] }
 0x180   :  { %v1005_v17 = vpop.f32.mrf.mxu2  ;;  %1495 = vmatpush.bf16.msrb.mxu1 %v2064_v50  ;;  %1511 = vmatpush.bf16.msrb.mxu2 %v2004_v6  ;;  %v2172_v50 = vor.u32 %v2386_v48, %v2171_v47  ;;  %v2176_v1 = vor.u32 %v2382_v49, %v2173_v53  ;;  %v2117_v6 = vld [vmem:[%s3365_s9 + $0xf8] sm:$0xf0]  ;;  %v2354_v63 = vld [vmem:[%s3365_s9 + $0x6c] sm:$0xf0]  ;;  %v2013_v48 = vld [vmem:[%s3365_s9 + $0x30] sm:$0xf0] }
 0x181   :  { %v1006_v21 = vadd.f32 %v1005_v17, %v992_v12  ;;  %v2204_v17 = vor.u32 %v2394_v62, %v2203_v2  ;;  %v2139_v12 = vld [vmem:[%s3365_s9 + $0x110] sm:$0xf]  ;;  %v2045_v62 = vld [vmem:[%s3365_s9 + $0x70] sm:$0xf0]  ;;  %v2044_v38 = vor.u32 %v2354_v63, %v2043_v61  ;;  %v2019_v49 = vld [vmem:[%s3365_s9 + $0x18] sm:$0xf] }
 0x182   :  { %1525 = vmatpush.bf16.msrb.mxu3 %v2008_v44  ;;  %1532 = vmatpush.bf16.msra.mxu0 %v2236_v52  ;;  %v2358_v44 = vld [vmem:[%s3365_s9 + $0x94] sm:$0xf]  ;;  %v2083_v52 = vld [vmem:[%s3365_s9 + $0x98] sm:$0xf]  ;;  %v2343_v53 = vld [vmem:[%s3365_s9 + $0x1c] sm:$0xf] }
 0x183   :  { %v1010_v14 = vmax.f32 %v1006_v21, 0.0  ;;  %v2147_v21 = vld [vmem:[%s3365_s9 + $0x118] sm:$0xf]  ;;  %v2080_v57 = vor.u32 %v2358_v44, %v2077_v51  ;;  %v2024_v7 = vor.u32 %v2343_v53, %v2021_v54 }
 0x184   :  { %1496 = vmatpush.bf16.msrb.mxu1 %v2032_v22  ;;  %1560 = vmatpush.bf16.msra.mxu2 %v2244_v59  ;;  %v2379_v22 = vld [vmem:[%s3365_s9 + $0x134] sm:$0xf0]  ;;  %v2085_v59 = vld [vmem:[%s3365_s9 + $0xb8] sm:$0xf0] }
 0x185   :  { %v2088_v2 = vor.u32 %v2359_v56, %v2085_v59 }
 0x186   :  { %1533 = vmatpush.bf16.msra.mxu0 %v2204_v17  ;;  %v2351_v17 = vld [vmem:[%s3365_s9 + $0x5c] sm:$0xf] }
 0x188   :  { %v1007_v25 = vpop.f32.mrf.mxu2  ;;  %1497 = vmatpush.bf16.msrb.mxu1 %v2000_v35  ;;  %1561 = vmatpush.bf16.msra.mxu2 %v2212_v42  ;;  %v2367_v35 = vld [vmem:[%s3365_s9 + $0xdc] sm:$0xf]  ;;  %v2011_v42 = vld [vmem:[%s3365_s9 + $0x10] sm:$0xf] }
 0x189   :  { %v1008_v10 = vadd.f32 %v1007_v25, %v994_v19  ;;  %v2140_v19 = vor.u32 %v2378_v15, %v2139_v12  ;;  %v2148_v25 = vor.u32 %v2379_v22, %v2147_v21  ;;  %v2120_v39 = vor.u32 %v2367_v35, %v2117_v6  ;;  %v2408_v12 = vld [vmem:[%s3364_s8] ss:$0 sm:$0xff] }
 0x18a   :  { %1534 = vmatpush.bf16.msra.mxu0 %v2172_v50  ;;  %v2347_v50 = vld [vmem:[%s3365_s9 + $0x34] sm:$0xf0]  ;;  %v2012_v0 = vor.u32 %v2346_v45, %v2011_v42 }
 0x18b   :  { %v1011_v26 = vmax.f32 %v1008_v10, 0.0  ;;  %v2149_v10 = vld [vmem:[%s3365_s9 + $0x138] sm:$0xf0] }
 0x18c   :  { %1546 = vmatpush.bf16.msra.mxu1 %v2240_v58  ;;  %1562 = vmatpush.bf16.msra.mxu2 %v2180_v3  ;;  %v2084_v58 = vor.u32 %v2363_v55, %v2083_v52  ;;  %v2020_v3 = vor.u32 %v2347_v50, %v2019_v49 }
 0x18d   :  { %v1012_v27 = vpack.c.bf16 %v1011_v26, %v1010_v14  ;;  %v2152_v14 = vor.u32 %v2375_v8, %v2149_v10  ;;  %v2107_v26 = vld [vmem:[%s3365_s9 + $0xd0] sm:$0xf] }
 0x18e   :  { %1535 = vmatpush.bf16.msra.mxu0 %v2140_v19 }
 0x18f   :  { %1992 = vmatmul.msk.bf16.vlgmr.msra.gmra.mxu3 %vm829_vm3, %v1012_v27  ;;  %v2370_v27 = vld [vmem:[%s3365_s9 + $0xec] sm:$0xf0] }
 0x190   :  { %1574 = vmatpush.bf16.msra.mxu3 %v2248_v24  ;;  %1547 = vmatpush.bf16.msra.mxu1 %v2208_v18  ;;  %v2108_v29 = vor.u32 %v2370_v27, %v2107_v26  ;;  %v2350_v24 = vld [vmem:[%s3365_s9 + $0x54] sm:$0xf]  ;;  %v2053_v18 = vld [vmem:[%s3365_s9 + $0x78] sm:$0xf0] }
 0x191   :  { %1563 = vmatpush.bf16.msra.mxu2 %v2148_v25  ;;  %v2048_v40 = vor.u32 %v2350_v24, %v2045_v62  ;;  %v2056_v47 = vor.u32 %v2351_v17, %v2053_v18 }
 0x192   :  { %1536 = vmatpush.bf16.msra.mxu0 %v2108_v29 }
 0x194   :  { %1575 = vmatpush.bf16.msra.mxu3 %v2216_v46  ;;  %1548 = vmatpush.bf16.msra.mxu1 %v2176_v1  ;;  %v2342_v46 = vld [vmem:[%s3365_s9 + $0x14] sm:$0xf] }
 0x195   :  { %1564 = vmatpush.bf16.msra.mxu2 %v2116_v34  ;;  %v2016_v1 = vor.u32 %v2342_v46, %v2013_v48 }
 0x196   :  { %1537 = vmatpush.bf16.msra.mxu0 %v2076_v13 }
 0x198   :  { %1576 = vmatpush.bf16.msra.mxu3 %v2184_v11  ;;  %1549 = vmatpush.bf16.msra.mxu1 %v2144_v23 }
 0x199   :  { %1565 = vmatpush.bf16.msra.mxu2 %v2084_v58 }
 0x19a   :  { %1538 = vmatpush.bf16.msra.mxu0 %v2044_v38 }
 0x19c   :  { %1577 = vmatpush.bf16.msra.mxu3 %v2152_v14  ;;  %1550 = vmatpush.bf16.msra.mxu1 %v2112_v33 }
 0x19d   :  { %1566 = vmatpush.bf16.msra.mxu2 %v2052_v41 }
 0x19e   :  { %1539 = vmatpush.bf16.msra.mxu0 %v2012_v0 }
 0x1a0   :  { %1578 = vmatpush.bf16.msra.mxu3 %v2120_v39  ;;  %1551 = vmatpush.bf16.msra.mxu1 %v2080_v57 }
 0x1a1   :  { %1567 = vmatpush.bf16.msra.mxu2 %v2020_v3 }
 0x1a4   :  { %1579 = vmatpush.bf16.msra.mxu3 %v2088_v2  ;;  %1552 = vmatpush.bf16.msra.mxu1 %v2048_v40 }
 0x1a8   :  { %1580 = vmatpush.bf16.msra.mxu3 %v2056_v47  ;;  %1553 = vmatpush.bf16.msra.mxu1 %v2016_v1 }
 0x1ac   :  { %1581 = vmatpush.bf16.msra.mxu3 %v2024_v7 }
 0x212   :  { %v1058_v9 = vpop.f32.mrf.mxu3 }
 0x213   :  { %v1063_v11 = vadd.f32 %v1058_v9, %v2893_v30  ;;  %v1138_v30 = vld [vmem:[%s3366_s10] sm:$0xff] }
 0x214   :  { %v1140_v25 = vperm.slane %v1138_v30, 0  ;;  %v1141_v8 = vperm.slane %v1138_v30, 1  ;;  %v1142_v27 = vperm.slane %v1138_v30, 2  ;;  %v1143_v28 = vperm.slane %v1138_v30, 3 }
 0x215   :  { %v1069_v16 = vadd.f32 %v2408_v12, %v1063_v11  ;;  %v1144_v37 = vperm.slane %v1138_v30, 4  ;;  %v1145_v39 = vperm.slane %v1138_v30, 5  ;;  %v1146_v58 = vperm.slane %v1138_v30, 6 }
 0x216   :  { %v1147_v59 = vperm.slane %v1138_v30, 7 }
 0x217   :  { %v1071_v21 = vmax.f32 %v1069_v16, 0.0 }
 0x21a   :  { %v1060_v15 = vpop.f32.mrf.mxu3 }
 0x21b   :  { %v1064_v19 = vadd.f32 %v1060_v15, %v2902_v36 }
 0x21d   :  { %v1070_v20 = vadd.f32 %v2408_v12, %v1064_v19 }
 0x21f   :  { %v1072_v22 = vmax.f32 %v1070_v20, 0.0 }
 0x221   :  { %v1073_v23 = vpack.c.bf16 %v1072_v22, %v1071_v21 }
 0x223   :  { %1484 = vmatmul.bf16.vlgmr.msrb.gmra.mxu0 %v1073_v23  ;;  %1498 = vmatmul.bf16.vlgmr.msrb.gmra.mxu1 %v1073_v23 }
 0x224   :  { %1512 = vmatmul.bf16.vlgmr.msrb.gmra.mxu2 %v1073_v23  ;;  %1526 = vmatmul.bf16.vlgmr.msrb.gmra.mxu3 %v1073_v23 }
 0x233   :  { %1540 = vmatmul.bf16.vlgmr.msra.gmra.mxu0 %v1073_v23  ;;  %1554 = vmatmul.bf16.vlgmr.msra.gmra.mxu1 %v1073_v23 }
 0x234   :  { %1568 = vmatmul.bf16.vlgmr.msra.gmra.mxu2 %v1073_v23  ;;  %1582 = vmatmul.bf16.vlgmr.msra.gmra.mxu3 %v1073_v23 }
 0x2a0   :  { %v1485_v10 = vpop.f32.mrf.mxu0  ;;  %v1499_v36 = vpop.f32.mrf.mxu1 }
 0x2a1   :  { %v1486_v14 = vadd.f32 %v1485_v10, %v1140_v25  ;;  %v1500_v26 = vadd.f32 %v1499_v36, %v1141_v8 }
 0x2a3   :  { %1588 = vst [vmem:[%s3367_s11] sm:$0xff] %v1486_v14 }
 0x2a4   :  { %1589 = vst [vmem:[%s3367_s11 + $0x8] sm:$0xff] %v1500_v26 }
 0x2a7   :  { %v1513_v29 = vpop.f32.mrf.mxu2  ;;  %v1527_v31 = vpop.f32.mrf.mxu3 }
 0x2a8   :  { %v1514_v32 = vadd.f32 %v1513_v29, %v1142_v27  ;;  %v1528_v60 = vadd.f32 %v1527_v31, %v1143_v28  ;;  %v1487_v33 = vpop.f32.mrf.mxu0  ;;  %v1501_v34 = vpop.f32.mrf.mxu1 }
 0x2a9   :  { %v1488_v35 = vadd.f32 %v1487_v33, %v1140_v25  ;;  %v1502_v6 = vadd.f32 %v1501_v34, %v1141_v8 }
 0x2aa   :  { %1590 = vst [vmem:[%s3367_s11 + $0x10] sm:$0xff] %v1514_v32 }
 0x2ab   :  { %1591 = vst [vmem:[%s3367_s11 + $0x18] sm:$0xff] %v1528_v60 }
 0x2ac   :  { %1596 = vst [vmem:[%s3367_s11 + $0x40] sm:$0xff] %v1488_v35 }
 0x2ad   :  { %1597 = vst [vmem:[%s3367_s11 + $0x48] sm:$0xff] %v1502_v6 }
 0x2af   :  { %v1515_v43 = vpop.f32.mrf.mxu2  ;;  %v1529_v44 = vpop.f32.mrf.mxu3 }
 0x2b0   :  { %v1516_v51 = vadd.f32 %v1515_v43, %v1142_v27  ;;  %v1530_v13 = vadd.f32 %v1529_v44, %v1143_v28  ;;  %v1541_v52 = vpop.f32.mrf.mxu0  ;;  %v1555_v55 = vpop.f32.mrf.mxu1 }
 0x2b1   :  { %v1542_v56 = vadd.f32 %v1541_v52, %v1144_v37  ;;  %v1556_v57 = vadd.f32 %v1555_v55, %v1145_v39 }
 0x2b2   :  { %1598 = vst [vmem:[%s3367_s11 + $0x50] sm:$0xff] %v1516_v51 }
 0x2b3   :  { %1599 = vst [vmem:[%s3367_s11 + $0x58] sm:$0xff] %v1530_v13 }
 0x2b4   :  { %1592 = vst [vmem:[%s3367_s11 + $0x20] sm:$0xff] %v1542_v56 }
 0x2b5   :  { %1593 = vst [vmem:[%s3367_s11 + $0x28] sm:$0xff] %v1556_v57 }
 0x2b7   :  { %v1569_v61 = vpop.f32.mrf.mxu2  ;;  %v1583_v63 = vpop.f32.mrf.mxu3 }
 0x2b8   :  { %v1570_v2 = vadd.f32 %v1569_v61, %v1146_v58  ;;  %v1584_v24 = vadd.f32 %v1583_v63, %v1147_v59  ;;  %v1543_v62 = vpop.f32.mrf.mxu0  ;;  %v1557_v4 = vpop.f32.mrf.mxu1 }
 0x2b9   :  { %v1544_v5 = vadd.f32 %v1543_v62, %v1144_v37  ;;  %v1558_v17 = vadd.f32 %v1557_v4, %v1145_v39 }
 0x2ba   :  { %1594 = vst [vmem:[%s3367_s11 + $0x30] sm:$0xff] %v1570_v2 }
 0x2bb   :  { %1595 = vst [vmem:[%s3367_s11 + $0x38] sm:$0xff] %v1584_v24 }
 0x2bc   :  { %1600 = vst [vmem:[%s3367_s11 + $0x60] sm:$0xff] %v1544_v5 }
 0x2bd   :  { %1601 = vst [vmem:[%s3367_s11 + $0x68] sm:$0xff] %v1558_v17 }
 0x2bf   :  { %v1571_v18 = vpop.f32.mrf.mxu2  ;;  %v1585_v38 = vpop.f32.mrf.mxu3 }
 0x2c0   :  { %v1572_v40 = vadd.f32 %v1571_v18, %v1146_v58  ;;  %v1586_v41 = vadd.f32 %v1585_v38, %v1147_v59 }
 0x2c2   :  { %1602 = vst [vmem:[%s3367_s11 + $0x70] sm:$0xff] %v1572_v40 }
 0x2c3   :  { %1603 = vst [vmem:[%s3367_s11 + $0x78] sm:$0xff] %v1586_v41 }
 0x2c4   :  { %1608 = vsyncpa [#allocation3], 1 }

</bundles_post_ra>
